<compile_context>
chip_gen: v6e
topology: v6e:2x2x1
jax: 0.10.0
libtpu: 0.0.40
codegen_flags: <defaults>
</compile_context>

<pallas_src>
import functools

import jax
import jax.numpy as jnp
from jax.experimental import pallas as pl
from jax.experimental.pallas import tpu as pltpu


def mlp_kernel(params_ref, x_ref, o_ref, *, n_hidden):
    """params_ref: SMEM f32[3*H + 1] = [w1(H), b1(H), w2(H), b2(1)].
       x_ref/o_ref: VMEM f32[(n_padded/128), 128] -- batch laid lane-dense."""
    x = x_ref[...]                       # whole padded batch, lane-dense vreg(s)
    acc = jnp.zeros_like(x)
    # Statically unrolled hidden layer: n_hidden scalar-broadcast FMAs + ReLU on the VPU.
    for h in range(n_hidden):
        w1_h = params_ref[h]
        b1_h = params_ref[n_hidden + h]
        w2_h = params_ref[2 * n_hidden + h]
        acc = acc + jnp.maximum(x * w1_h + b1_h, 0.0) * w2_h
    b2 = params_ref[3 * n_hidden]
    o_ref[...] = (acc + b2).astype(o_ref.dtype)


def net_forward(x, w1, b1, w2, b2):
    """x: (N, n_feature); w1: (n_feature, n_hidden); b1: (1, n_hidden);
       w2: (n_hidden, n_output); b2: (1, n_output).
       Specialized for the module's usage: n_feature == 1 and n_output == 1."""
    n, n_feature = x.shape
    n_hidden = w1.shape[1]
    n_output = w2.shape[1]
    assert n_feature == 1 and n_output == 1, "kernel specialized for F=1, O=1 (as in the spec)"

    # Pack all parameters into one small 1-D array that lives in SMEM.
    params = jnp.concatenate(
        [w1.reshape(-1), b1.reshape(-1), w2.reshape(-1), b2.reshape(-1)]
    ).astype(jnp.float32)

    # Lane-dense batch layout: pad N up to a whole number of (8,128) f32 vregs.
    lane = 128
    sub = 8
    n_padded = pl.cdiv(n, sub * lane) * (sub * lane)
    x_flat = jnp.zeros((n_padded,), jnp.float32).at[:n].set(x.reshape(-1).astype(jnp.float32))
    x_vreg = x_flat.reshape(n_padded // lane, lane)

    kernel = functools.partial(mlp_kernel, n_hidden=n_hidden)
    y_vreg = pl.pallas_call(
        kernel,
        out_shape=jax.ShapeDtypeStruct((n_padded // lane, lane), jnp.float32),
        in_specs=[
            pl.BlockSpec(memory_space=pltpu.MemorySpace.SMEM),   # packed scalars
            pl.BlockSpec(memory_space=pltpu.MemorySpace.VMEM),   # lane-dense batch
        ],
        out_specs=pl.BlockSpec(memory_space=pltpu.MemorySpace.VMEM),
    )(params, x_vreg)

    # Slice the padded lane-dense result back to the module's (N, 1) shape.
    return y_vreg.reshape(-1)[:n].reshape(n, n_output).astype(x.dtype)


def init_linear_params(key, in_features, out_features, dtype=jnp.float32):
    """Deterministic init mimicking torch.nn.Linear default (uniform +/- 1/sqrt(fan_in)).
    Weight is stored pre-transposed as (in_features, out_features)."""
    k_w, k_b = jax.random.split(key)
    bound = 1.0 / (in_features ** 0.5)
    w = jax.random.uniform(k_w, (in_features, out_features), dtype, -bound, bound)
    b = jax.random.uniform(k_b, (1, out_features), dtype, -bound, bound)
    return w, b


if __name__ == "__main__":
    # Shapes implied by the module/script: x = linspace(-1, 1, 100).unsqueeze(1)
    n_samples, n_feature, n_hidden, n_output = 100, 1, 10, 1

    key = jax.random.PRNGKey(0)
    k1, k2 = jax.random.split(key)
    w1, b1 = init_linear_params(k1, n_feature, n_hidden)
    w2, b2 = init_linear_params(k2, n_hidden, n_output)

    x = jnp.linspace(-1.0, 1.0, n_samples, dtype=jnp.float32).reshape(n_samples, 1)

    y = net_forward(x, w1, b1, w2, b2)
    jax.block_until_ready(y)

    # Cross-check against plain JAX reference of the same forward pass (exact f32 path).
    y_ref = jnp.maximum(x @ w1 + b1, 0.0) @ w2 + b2
    assert y.shape == (n_samples, n_output)
    assert jnp.allclose(y, y_ref, atol=1e-5, rtol=1e-5)

    print("KERNEL_OK")
</pallas_src>

<mosaic_0001>
module attributes {stable_mosaic.version = 11 : i64} {
  func.func @mlp_kernel(%arg0: memref<31xf32, #tpu.memory_space<smem>>, %arg1: memref<8x128xf32, #tpu.memory_space<vmem>>, %arg2: memref<8x128xf32, #tpu.memory_space<vmem>>) attributes {dimension_semantics = [], scalar_prefetch = 0 : i64, scratch_operands = 0 : i64, tpu.core_type = #tpu.core_type<tc>} {
    %c0 = arith.constant 0 : index
    %c0_0 = arith.constant 0 : index
    %0 = vector.load %arg1[%c0, %c0_0] : memref<8x128xf32, #tpu.memory_space<vmem>>, vector<8x128xf32>
    %cst = arith.constant 0.000000e+00 : f32
    %1 = vector.broadcast %cst : f32 to vector<8x128xf32>
    %c0_1 = arith.constant 0 : index
    %2 = memref.load %arg0[%c0_1] : memref<31xf32, #tpu.memory_space<smem>>
    %c10 = arith.constant 10 : index
    %3 = memref.load %arg0[%c10] : memref<31xf32, #tpu.memory_space<smem>>
    %c20 = arith.constant 20 : index
    %4 = memref.load %arg0[%c20] : memref<31xf32, #tpu.memory_space<smem>>
    %5 = vector.broadcast %2 : f32 to vector<8x128xf32>
    %6 = arith.mulf %0, %5 : vector<8x128xf32>
    %7 = vector.broadcast %3 : f32 to vector<8x128xf32>
    %8 = arith.addf %6, %7 : vector<8x128xf32>
    %cst_2 = arith.constant 0.000000e+00 : f32
    %9 = vector.broadcast %cst_2 : f32 to vector<8x128xf32>
    %10 = arith.maximumf %8, %9 : vector<8x128xf32>
    %11 = vector.broadcast %4 : f32 to vector<8x128xf32>
    %12 = arith.mulf %10, %11 : vector<8x128xf32>
    %13 = arith.addf %1, %12 : vector<8x128xf32>
    %c1 = arith.constant 1 : index
    %14 = memref.load %arg0[%c1] : memref<31xf32, #tpu.memory_space<smem>>
    %c11 = arith.constant 11 : index
    %15 = memref.load %arg0[%c11] : memref<31xf32, #tpu.memory_space<smem>>
    %c21 = arith.constant 21 : index
    %16 = memref.load %arg0[%c21] : memref<31xf32, #tpu.memory_space<smem>>
    %17 = vector.broadcast %14 : f32 to vector<8x128xf32>
    %18 = arith.mulf %0, %17 : vector<8x128xf32>
    %19 = vector.broadcast %15 : f32 to vector<8x128xf32>
    %20 = arith.addf %18, %19 : vector<8x128xf32>
    %cst_3 = arith.constant 0.000000e+00 : f32
    %21 = vector.broadcast %cst_3 : f32 to vector<8x128xf32>
    %22 = arith.maximumf %20, %21 : vector<8x128xf32>
    %23 = vector.broadcast %16 : f32 to vector<8x128xf32>
    %24 = arith.mulf %22, %23 : vector<8x128xf32>
    %25 = arith.addf %13, %24 : vector<8x128xf32>
    %c2 = arith.constant 2 : index
    %26 = memref.load %arg0[%c2] : memref<31xf32, #tpu.memory_space<smem>>
    %c12 = arith.constant 12 : index
    %27 = memref.load %arg0[%c12] : memref<31xf32, #tpu.memory_space<smem>>
    %c22 = arith.constant 22 : index
    %28 = memref.load %arg0[%c22] : memref<31xf32, #tpu.memory_space<smem>>
    %29 = vector.broadcast %26 : f32 to vector<8x128xf32>
    %30 = arith.mulf %0, %29 : vector<8x128xf32>
    %31 = vector.broadcast %27 : f32 to vector<8x128xf32>
    %32 = arith.addf %30, %31 : vector<8x128xf32>
    %cst_4 = arith.constant 0.000000e+00 : f32
    %33 = vector.broadcast %cst_4 : f32 to vector<8x128xf32>
    %34 = arith.maximumf %32, %33 : vector<8x128xf32>
    %35 = vector.broadcast %28 : f32 to vector<8x128xf32>
    %36 = arith.mulf %34, %35 : vector<8x128xf32>
    %37 = arith.addf %25, %36 : vector<8x128xf32>
    %c3 = arith.constant 3 : index
    %38 = memref.load %arg0[%c3] : memref<31xf32, #tpu.memory_space<smem>>
    %c13 = arith.constant 13 : index
    %39 = memref.load %arg0[%c13] : memref<31xf32, #tpu.memory_space<smem>>
    %c23 = arith.constant 23 : index
    %40 = memref.load %arg0[%c23] : memref<31xf32, #tpu.memory_space<smem>>
    %41 = vector.broadcast %38 : f32 to vector<8x128xf32>
    %42 = arith.mulf %0, %41 : vector<8x128xf32>
    %43 = vector.broadcast %39 : f32 to vector<8x128xf32>
    %44 = arith.addf %42, %43 : vector<8x128xf32>
    %cst_5 = arith.constant 0.000000e+00 : f32
    %45 = vector.broadcast %cst_5 : f32 to vector<8x128xf32>
    %46 = arith.maximumf %44, %45 : vector<8x128xf32>
    %47 = vector.broadcast %40 : f32 to vector<8x128xf32>
    %48 = arith.mulf %46, %47 : vector<8x128xf32>
    %49 = arith.addf %37, %48 : vector<8x128xf32>
    %c4 = arith.constant 4 : index
    %50 = memref.load %arg0[%c4] : memref<31xf32, #tpu.memory_space<smem>>
    %c14 = arith.constant 14 : index
    %51 = memref.load %arg0[%c14] : memref<31xf32, #tpu.memory_space<smem>>
    %c24 = arith.constant 24 : index
    %52 = memref.load %arg0[%c24] : memref<31xf32, #tpu.memory_space<smem>>
    %53 = vector.broadcast %50 : f32 to vector<8x128xf32>
    %54 = arith.mulf %0, %53 : vector<8x128xf32>
    %55 = vector.broadcast %51 : f32 to vector<8x128xf32>
    %56 = arith.addf %54, %55 : vector<8x128xf32>
    %cst_6 = arith.constant 0.000000e+00 : f32
    %57 = vector.broadcast %cst_6 : f32 to vector<8x128xf32>
    %58 = arith.maximumf %56, %57 : vector<8x128xf32>
    %59 = vector.broadcast %52 : f32 to vector<8x128xf32>
    %60 = arith.mulf %58, %59 : vector<8x128xf32>
    %61 = arith.addf %49, %60 : vector<8x128xf32>
    %c5 = arith.constant 5 : index
    %62 = memref.load %arg0[%c5] : memref<31xf32, #tpu.memory_space<smem>>
    %c15 = arith.constant 15 : index
    %63 = memref.load %arg0[%c15] : memref<31xf32, #tpu.memory_space<smem>>
    %c25 = arith.constant 25 : index
    %64 = memref.load %arg0[%c25] : memref<31xf32, #tpu.memory_space<smem>>
    %65 = vector.broadcast %62 : f32 to vector<8x128xf32>
    %66 = arith.mulf %0, %65 : vector<8x128xf32>
    %67 = vector.broadcast %63 : f32 to vector<8x128xf32>
    %68 = arith.addf %66, %67 : vector<8x128xf32>
    %cst_7 = arith.constant 0.000000e+00 : f32
    %69 = vector.broadcast %cst_7 : f32 to vector<8x128xf32>
    %70 = arith.maximumf %68, %69 : vector<8x128xf32>
    %71 = vector.broadcast %64 : f32 to vector<8x128xf32>
    %72 = arith.mulf %70, %71 : vector<8x128xf32>
    %73 = arith.addf %61, %72 : vector<8x128xf32>
    %c6 = arith.constant 6 : index
    %74 = memref.load %arg0[%c6] : memref<31xf32, #tpu.memory_space<smem>>
    %c16 = arith.constant 16 : index
    %75 = memref.load %arg0[%c16] : memref<31xf32, #tpu.memory_space<smem>>
    %c26 = arith.constant 26 : index
    %76 = memref.load %arg0[%c26] : memref<31xf32, #tpu.memory_space<smem>>
    %77 = vector.broadcast %74 : f32 to vector<8x128xf32>
    %78 = arith.mulf %0, %77 : vector<8x128xf32>
    %79 = vector.broadcast %75 : f32 to vector<8x128xf32>
    %80 = arith.addf %78, %79 : vector<8x128xf32>
    %cst_8 = arith.constant 0.000000e+00 : f32
    %81 = vector.broadcast %cst_8 : f32 to vector<8x128xf32>
    %82 = arith.maximumf %80, %81 : vector<8x128xf32>
    %83 = vector.broadcast %76 : f32 to vector<8x128xf32>
    %84 = arith.mulf %82, %83 : vector<8x128xf32>
    %85 = arith.addf %73, %84 : vector<8x128xf32>
    %c7 = arith.constant 7 : index
    %86 = memref.load %arg0[%c7] : memref<31xf32, #tpu.memory_space<smem>>
    %c17 = arith.constant 17 : index
    %87 = memref.load %arg0[%c17] : memref<31xf32, #tpu.memory_space<smem>>
    %c27 = arith.constant 27 : index
    %88 = memref.load %arg0[%c27] : memref<31xf32, #tpu.memory_space<smem>>
    %89 = vector.broadcast %86 : f32 to vector<8x128xf32>
    %90 = arith.mulf %0, %89 : vector<8x128xf32>
    %91 = vector.broadcast %87 : f32 to vector<8x128xf32>
    %92 = arith.addf %90, %91 : vector<8x128xf32>
    %cst_9 = arith.constant 0.000000e+00 : f32
    %93 = vector.broadcast %cst_9 : f32 to vector<8x128xf32>
    %94 = arith.maximumf %92, %93 : vector<8x128xf32>
    %95 = vector.broadcast %88 : f32 to vector<8x128xf32>
    %96 = arith.mulf %94, %95 : vector<8x128xf32>
    %97 = arith.addf %85, %96 : vector<8x128xf32>
    %c8 = arith.constant 8 : index
    %98 = memref.load %arg0[%c8] : memref<31xf32, #tpu.memory_space<smem>>
    %c18 = arith.constant 18 : index
    %99 = memref.load %arg0[%c18] : memref<31xf32, #tpu.memory_space<smem>>
    %c28 = arith.constant 28 : index
    %100 = memref.load %arg0[%c28] : memref<31xf32, #tpu.memory_space<smem>>
    %101 = vector.broadcast %98 : f32 to vector<8x128xf32>
    %102 = arith.mulf %0, %101 : vector<8x128xf32>
    %103 = vector.broadcast %99 : f32 to vector<8x128xf32>
    %104 = arith.addf %102, %103 : vector<8x128xf32>
    %cst_10 = arith.constant 0.000000e+00 : f32
    %105 = vector.broadcast %cst_10 : f32 to vector<8x128xf32>
    %106 = arith.maximumf %104, %105 : vector<8x128xf32>
    %107 = vector.broadcast %100 : f32 to vector<8x128xf32>
    %108 = arith.mulf %106, %107 : vector<8x128xf32>
    %109 = arith.addf %97, %108 : vector<8x128xf32>
    %c9 = arith.constant 9 : index
    %110 = memref.load %arg0[%c9] : memref<31xf32, #tpu.memory_space<smem>>
    %c19 = arith.constant 19 : index
    %111 = memref.load %arg0[%c19] : memref<31xf32, #tpu.memory_space<smem>>
    %c29 = arith.constant 29 : index
    %112 = memref.load %arg0[%c29] : memref<31xf32, #tpu.memory_space<smem>>
    %113 = vector.broadcast %110 : f32 to vector<8x128xf32>
    %114 = arith.mulf %0, %113 : vector<8x128xf32>
    %115 = vector.broadcast %111 : f32 to vector<8x128xf32>
    %116 = arith.addf %114, %115 : vector<8x128xf32>
    %cst_11 = arith.constant 0.000000e+00 : f32
    %117 = vector.broadcast %cst_11 : f32 to vector<8x128xf32>
    %118 = arith.maximumf %116, %117 : vector<8x128xf32>
    %119 = vector.broadcast %112 : f32 to vector<8x128xf32>
    %120 = arith.mulf %118, %119 : vector<8x128xf32>
    %121 = arith.addf %109, %120 : vector<8x128xf32>
    %c30 = arith.constant 30 : index
    %122 = memref.load %arg0[%c30] : memref<31xf32, #tpu.memory_space<smem>>
    %123 = vector.broadcast %122 : f32 to vector<8x128xf32>
    %124 = arith.addf %121, %123 : vector<8x128xf32>
    %c0_12 = arith.constant 0 : index
    %c0_13 = arith.constant 0 : index
    %125 = vector.load %arg2[%c0_12, %c0_13] : memref<8x128xf32, #tpu.memory_space<vmem>>, vector<8x128xf32>
    tpu.vector_store %arg2[%c0_12, %c0_13], %124 {strides = array<i32>} : memref<8x128xf32, #tpu.memory_space<vmem>>, vector<8x128xf32>,
    return
  }
}

</mosaic_0001>

<bundles_post_ra>
// kernel: tpu_custom_call.1
= control target key start
LH: loop header
LB: loop body
LE: loop exit
PB: predicated region body
PF: predicated region fallthrough
CT: control target
= control target key end

     0   :  { %7 = vsyncpa [#allocation5], 0  ;;  %s313_s0 = inlined_call_operand.hbm [shape: f32[31], index: 0, kind: input, shape index: {}]   ;;  %s314_s1 = inlined_call_operand.hbm [shape: f32[8,128], index: 1, kind: input, shape index: {}]   ;;  %s315_s2 = inlined_call_operand.hbm [shape: f32[8,128], index: 2, kind: output, shape index: {}]  }
   0x1   :  { %8 = vsyncpa [#allocation3], 0 }
   0x2   :  { %9 = vsyncpa [#allocation4], 0  ;;  %s253_s9 = smov [#allocation2]   ;;  %s254_s12 = smov [#allocation6]  }
   0x3   :  { %17 = dma.hbm_to_smem %s313_s0, 16, %s253_s9, [#allocation5]  }
   0x4   :  { %s24_s13 = sshll.u32 %s254_s12, 4  ;;  %s25_s13 = int_to_ptr.vmem [resolvable:$true] %s24_s13 }
   0x5   :  { %s215_s14 = scalar_lea.vmem %s25_s13, 128  ;;  %p220_p1 = scmp.lt.s32.totalorder %s25_s13, %s25_s13 }
   0x6   :  { %p216_p0 = scmp.ne.s32.totalorder %s25_s13, %s215_s14  ;;  %p221_p2 = scmp.lt.s32.totalorder %s215_s14, %s215_s14 }
   0x8   :  { %p222_p3 = por %p221_p2, %p220_p1 }
   0xa   :  { %p223_p4 = pnand %p222_p3, %p216_p0 }
   0xc   :  { %226 = shalt.err (!%p223_p4)
}
   0xd   :  { %27 = dma.hbm_to_vmem [thread:$0]  %s314_s1, 128, %s25_s13, [#allocation3]  }
   0xe   :  { %247 = dma.done.wait [#allocation5], 16  }
   0xf   :  { %248 = vsyncadd [#allocation5], 4294967280 }
  0x10   :  { %249 = dma.done.wait [#allocation3], 128  }
  0x11   :  { %250 = vsyncadd [#allocation3], 4294967168 }
  0x12   :  { %34 = sfence }
  0x13   :  { %s36_s0 = sld [smem:[#allocation2]]  ;;  %v277_v0 = vld [vmem:[#allocation6] sm:$0xff] }
  0x14   :  { %s166_s17 = sld [smem:[#allocation2 + $0xa]] }
  0x15   :  { %s167_s18 = sld [smem:[#allocation2 + $0x14]] }
  0x16   :  { %s168_s19 = sld [smem:[#allocation2 + $0x1]] }
  0x17   :  { %s169_s20 = sld [smem:[#allocation2 + $0xb]] }
  0x18   :  { %s170_s21 = sld [smem:[#allocation2 + $0x15]] }
  0x19   :  { %v39_v1 = vstv %s36_s0  ;;  %s171_s22 = sld [smem:[#allocation2 + $0x2]] }
  0x1a   :  { %v40_v2 = vmul.f32 %v39_v1, %v277_v0  ;;  %v41_v3 = vstv %s166_s17  ;;  %s172_s23 = sld [smem:[#allocation2 + $0xc]]  ;;  %s255_s17 = smov [#allocation7]  }
  0x1b   :  { %s280_s1 = sld [smem:[#allocation2 + $0x16]]  ;;  %v44_v9 = vstv %s167_s18  ;;  %s156_s18 = sshll.u32 %s255_s17, 4  ;;  %s157_s18 = int_to_ptr.vmem [resolvable:$true] %s156_s18 }
  0x1c   :  { %v42_v4 = vadd.f32 %v41_v3, %v40_v2  ;;  %v50_v5 = vstv %s168_s19  ;;  %s174_s24 = sld [smem:[#allocation2 + $0x3]]  ;;  %s227_s19 = scalar_lea.vmem %s157_s18, 128 }
  0x1d   :  { %v51_v6 = vmul.f32 %v50_v5, %v277_v0  ;;  %v52_v7 = vstv %s169_s20  ;;  %s175_s25 = sld [smem:[#allocation2 + $0xd]]  ;;  %p228_p5 = scmp.ne.s32.totalorder %s157_s18, %s227_s19 }
  0x1e   :  { %v43_v8 = vmax.f32 %v42_v4, 0.0  ;;  %s283_s26 = sld [smem:[#allocation2 + $0x17]]  ;;  %v55_v12 = vstv %s170_s21  ;;  %p232_p6 = scmp.lt.s32.totalorder %s157_s18, %s157_s18 }
  0x1f   :  { %v53_v10 = vadd.f32 %v52_v7, %v51_v6  ;;  %v61_v11 = vstv %s171_s22  ;;  %s177_s27 = sld [smem:[#allocation2 + $0x4]]  ;;  %p233_p7 = scmp.lt.s32.totalorder %s227_s19, %s227_s19 }
  0x20   :  { %v62_v13 = vmul.f32 %v61_v11, %v277_v0  ;;  %v63_v14 = vstv %s172_s23  ;;  %s178_s28 = sld [smem:[#allocation2 + $0xe]]  ;;  %v45_v15 = vmul.f32 %v44_v9, %v43_v8 }
  0x21   :  { %v54_v16 = vmax.f32 %v53_v10, 0.0  ;;  %s286_s29 = sld [smem:[#allocation2 + $0x18]]  ;;  %v66_v20 = vstv %s280_s1  ;;  %p234_p8 = por %p233_p7, %p232_p6 }
  0x22   :  { %v64_v17 = vadd.f32 %v63_v14, %v62_v13  ;;  %v72_v18 = vstv %s174_s24  ;;  %s180_s30 = sld [smem:[#allocation2 + $0x5]] }
  0x23   :  { %v56_v19 = vmul.f32 %v55_v12, %v54_v16  ;;  %v73_v21 = vmul.f32 %v72_v18, %v277_v0  ;;  %v74_v22 = vstv %s175_s25  ;;  %s181_s3 = sld [smem:[#allocation2 + $0xf]]  ;;  %p235_p9 = pnand %p234_p8, %p228_p5 }
  0x24   :  { %v65_v23 = vmax.f32 %v64_v17, 0.0  ;;  %s290_s4 = sld [smem:[#allocation2 + $0x19]]  ;;  %v77_v28 = vstv %s283_s26 }
  0x25   :  { %v57_v24 = vadd.f32 %v56_v19, %v45_v15  ;;  %v75_v25 = vadd.f32 %v74_v22, %v73_v21  ;;  %v83_v26 = vstv %s177_s27  ;;  %s183_s5 = sld [smem:[#allocation2 + $0x6]] }
  0x26   :  { %v67_v27 = vmul.f32 %v66_v20, %v65_v23  ;;  %v84_v29 = vmul.f32 %v83_v26, %v277_v0  ;;  %v85_v30 = vstv %s178_s28  ;;  %s184_s6 = sld [smem:[#allocation2 + $0x10]] }
  0x27   :  { %v76_v31 = vmax.f32 %v75_v25, 0.0  ;;  %s294_s7 = sld [smem:[#allocation2 + $0x1a]]  ;;  %v88_v36 = vstv %s286_s29 }
  0x28   :  { %v68_v32 = vadd.f32 %v67_v27, %v57_v24  ;;  %v86_v33 = vadd.f32 %v85_v30, %v84_v29  ;;  %v94_v34 = vstv %s180_s30  ;;  %s186_s8 = sld [smem:[#allocation2 + $0x7]] }
  0x29   :  { %v78_v35 = vmul.f32 %v77_v28, %v76_v31  ;;  %v95_v37 = vmul.f32 %v94_v34, %v277_v0  ;;  %v96_v38 = vstv %s181_s3  ;;  %s187_s9 = sld [smem:[#allocation2 + $0x11]] }
  0x2a   :  { %v87_v39 = vmax.f32 %v86_v33, 0.0  ;;  %s298_s10 = sld [smem:[#allocation2 + $0x1b]]  ;;  %v99_v44 = vstv %s290_s4 }
  0x2b   :  { %v79_v40 = vadd.f32 %v78_v35, %v68_v32  ;;  %v97_v41 = vadd.f32 %v96_v38, %v95_v37  ;;  %v105_v42 = vstv %s183_s5  ;;  %s189_s11 = sld [smem:[#allocation2 + $0x8]] }
  0x2c   :  { %v89_v43 = vmul.f32 %v88_v36, %v87_v39  ;;  %v106_v45 = vmul.f32 %v105_v42, %v277_v0  ;;  %v107_v46 = vstv %s184_s6  ;;  %s190_s12 = sld [smem:[#allocation2 + $0x12]] }
  0x2d   :  { %v98_v47 = vmax.f32 %v97_v41, 0.0  ;;  %s302_s13 = sld [smem:[#allocation2 + $0x1c]]  ;;  %v110_v52 = vstv %s294_s7 }
  0x2e   :  { %v90_v48 = vadd.f32 %v89_v43, %v79_v40  ;;  %v108_v49 = vadd.f32 %v107_v46, %v106_v45  ;;  %v116_v50 = vstv %s186_s8  ;;  %s192_s14 = sld [smem:[#allocation2 + $0x9]] }
  0x2f   :  { %v100_v51 = vmul.f32 %v99_v44, %v98_v47  ;;  %v117_v53 = vmul.f32 %v116_v50, %v277_v0  ;;  %v118_v54 = vstv %s187_s9  ;;  %s193_s15 = sld [smem:[#allocation2 + $0x13]] }
  0x30   :  { %v109_v55 = vmax.f32 %v108_v49, 0.0  ;;  %s194_s16 = sld [smem:[#allocation2 + $0x1d]]  ;;  %v121_v60 = vstv %s298_s10 }
  0x31   :  { %v101_v56 = vadd.f32 %v100_v51, %v90_v48  ;;  %v119_v57 = vadd.f32 %v118_v54, %v117_v53  ;;  %v127_v58 = vstv %s189_s11  ;;  %s195_s0 = sld [smem:[#allocation2 + $0x1e]] }
  0x32   :  { %v111_v59 = vmul.f32 %v110_v52, %v109_v55  ;;  %v128_v61 = vmul.f32 %v127_v58, %v277_v0  ;;  %v129_v62 = vstv %s190_s12 }
  0x33   :  { %v120_v63 = vmax.f32 %v119_v57, 0.0  ;;  %v132_v5 = vstv %s302_s13 }
  0x34   :  { %v112_v1 = vadd.f32 %v111_v59, %v101_v56  ;;  %v130_v2 = vadd.f32 %v129_v62, %v128_v61  ;;  %v138_v3 = vstv %s192_s14 }
  0x35   :  { %v122_v4 = vmul.f32 %v121_v60, %v120_v63  ;;  %v139_v6 = vmul.f32 %v138_v3, %v277_v0  ;;  %v140_v7 = vstv %s193_s15 }
  0x36   :  { %v131_v8 = vmax.f32 %v130_v2, 0.0  ;;  %v143_v12 = vstv %s194_s16 }
  0x37   :  { %v123_v9 = vadd.f32 %v122_v4, %v112_v1  ;;  %v141_v10 = vadd.f32 %v140_v7, %v139_v6  ;;  %v147_v16 = vstv %s195_s0 }
  0x38   :  { %v133_v11 = vmul.f32 %v132_v5, %v131_v8 }
  0x39   :  { %v142_v13 = vmax.f32 %v141_v10, 0.0 }
  0x3a   :  { %v134_v14 = vadd.f32 %v133_v11, %v123_v9 }
  0x3b   :  { %v144_v15 = vmul.f32 %v143_v12, %v142_v13 }
  0x3d   :  { %v145_v17 = vadd.f32 %v144_v15, %v134_v14 }
  0x3f   :  { %v148_v18 = vadd.f32 %v147_v16, %v145_v17 }
  0x41   :  { %149 = vst [vmem:[#allocation7] sm:$0xff] %v148_v18 }
  0x42   :  { %238 = shalt.err (!%p235_p9)
}
  0x43   :  { %159 = dma.vmem_to_hbm [thread:$0]  %s157_s18, 128, %s315_s2, [#allocation4]  }
  0x44   :  { %251 = dma.done.wait [#allocation4], 128  }
  0x45   :  { %252 = vsyncadd [#allocation4], 4294967168 }
  0x46   :  { %163 = vsyncpa [#allocation3], 1 }
  0x47   :  { %164 = vsyncpa [#allocation4], 1 }
  0x48   :  { %165 = vsyncpa [#allocation5], 1 }

</bundles_post_ra>
